<compile_context>
chip_gen: v6e
topology: v6e:2x2x1
jax: 0.10.0
libtpu: 0.0.40
codegen_flags: <defaults>
</compile_context>

<pallas_src>
import functools

import jax
import jax.numpy as jnp
from jax.experimental import pallas as pl
from jax.experimental.pallas import tpu as pltpu

T = 5                 # time_length // 20 with time_length = 100
C = 32                # num_channels of the ResBlock
TC = T * C            # 160 flattened ResBlock features
KSZ = 3               # conv kernel size (padding = 1)
H1, H2, OUT = 512, 32, 4
H2P = 128             # Linear2 output padded to a lane-dense 128
KPAD = 256            # fused conv2 K/N padded to a multiple of 128 (160 -> 256)
R_X = TC              # augmented-activation columns carrying the raw signal (shortcut)
R_ONE = TC + T        # augmented-activation column carrying the constant 1 (bias fold)
XAUG = T + 3          # X_aug columns: T+2 zero-padded signal samples + constant 1
XONE = T + 2          # index of the constant-1 column of X_aug
EPS = 1e-6            # F.pairwise_distance eps


def _mynet_kernel(xaug_ref, w1band_ref, wband_ref, wl1_ref, wl2_ref, bl2_ref,
                  wl3_ref, out_ref, *, bz_sup, bz_que):
    """xaug_ref: (Bpad, 8) = [x zero-padded in time (T+2) | 1], sup rows first."""
    f32, bf16 = jnp.float32, jnp.bfloat16

    # ---- conv1 (1->32, k=3, pad=1) + b1 + [x | 1] pass-through lanes ----
    # One tiny K=8 MXU pass; the MXU is otherwise idle in this phase, and it lands
    # the data directly in the correct lanes (no cross-lane scalar broadcasts).
    h = jnp.dot(xaug_ref[...].astype(bf16), w1band_ref[...],
                preferred_element_type=f32)                               # (B, 256)
    # ReLU only on the conv1 columns; raw-signal / constant-1 lanes pass through.
    conv_mask = jax.lax.broadcasted_iota(jnp.int32, (1, KPAD), 1) < TC
    a_aug = jnp.where(conv_mask, jnp.maximum(h, 0.0), h).astype(bf16)     # (B, 256)

    # ---- conv2(k=3) + 1x1 shortcut + conv biases: ONE (B,256)@(256,256) matmul ----
    res = jnp.maximum(
        jnp.dot(a_aug, wband_ref[...], preferred_element_type=f32), 0.0)  # (B, 256)
    # column R_ONE carries relu(1) == 1 so Linear1's bias folds into wl1_ref.

    # ---- Linear1 (C*T -> 512; flatten order + bias folded into packed weight) ----
    z1 = jnp.maximum(
        jnp.dot(res.astype(bf16), wl1_ref[...], preferred_element_type=f32), 0.0)

    # ---- Linear2 (512 -> 32, N padded to 128) + ReLU ----
    # Padded column H2 is forced to 1 via bl2_p so Linear3's bias rides in wl3_ref.
    z2 = jnp.maximum(
        jnp.dot(z1.astype(bf16), wl2_ref[...], preferred_element_type=f32)
        + bl2_ref[...], 0.0)                                              # (B, 128)

    # ---- Linear3 (32 -> 4, bias folded into row H2 of the padded weight) ----
    y = jnp.dot(z2.astype(bf16), wl3_ref[...], preferred_element_type=f32)  # (B, 4)

    # ---- repeat_interleave / repeat + pairwise_distance(p=2, eps=1e-6) ----
    # TODO(synk): at production batch sizes switch to the lane-dense
    #   ||s||^2 + ||q||^2 - 2*(y_sup @ y_que.T)  expansion with a 128-padded output.
    y_sup = y[:bz_sup, :]                                                 # (bs, 4)
    y_que = y[bz_sup:bz_sup + bz_que, :]                                  # (bq, 4)
    diff = y_sup[:, None, :] - y_que[None, :, :] + EPS                    # (bs, bq, 4)
    out_ref[...] = jnp.sqrt(jnp.sum(diff * diff, axis=-1))                # (bs, bq)


def _pack_operands(params):
    """Fuse / pad the per-layer params into MXU-friendly kernel operands.

    Only depends on the weights — in a real deployment this runs once.
    """
    f32, bf16 = jnp.float32, jnp.bfloat16

    # conv1 + b1 + pass-through lanes as an (8, 256) band acting on X_aug=[x_pad | 1].
    # h1[b, t*C+c] = sum_k x_pad[b, t+k] * w1[k, c] + b1[c]
    w1band = jnp.zeros((XAUG, KPAD), f32)
    for k in range(KSZ):
        for t in range(T):
            w1band = w1band.at[t + k, t * C:(t + 1) * C].set(params["w1"][k])
    for t in range(T):
        w1band = w1band.at[XONE, t * C:(t + 1) * C].set(params["b1"])  # conv1 bias
        w1band = w1band.at[t + 1, R_X + t].set(1.0)   # raw signal for 1x1 shortcut
    w1band = w1band.at[XONE, R_ONE].set(1.0)          # constant-1 lane
    w1band = w1band.astype(bf16)

    # Block-banded fused weight for conv2 + 1x1 shortcut + (b2+bs), acting on the
    # augmented activation [relu(h1) (t*C+c) | x_mid (T) | 1 | 0-pad].
    wband = jnp.zeros((KPAD, KPAD), f32)
    for k in range(KSZ):
        for t_out in range(T):
            t_in = t_out + k - 1                      # zero padding -> skip OOB taps
            if 0 <= t_in < T:
                wband = wband.at[t_in * C:(t_in + 1) * C,
                                 t_out * C:(t_out + 1) * C].set(params["w2"][k])
    for t in range(T):
        wband = wband.at[R_X + t, t * C:(t + 1) * C].set(params["ws"])
        wband = wband.at[R_ONE, t * C:(t + 1) * C].set(params["b2"] + params["bs"])
    wband = wband.at[R_ONE, R_ONE].set(1.0)           # pass the 1 through for bl1
    wband = wband.astype(bf16)

    # Linear1: rows follow the kernel's t*C+c layout (== PyTorch flatten c*T+t via
    # the tap layout of params["wl1"]); row R_ONE carries the bias.
    wl1_big = jnp.zeros((KPAD, H1), f32)
    wl1_big = wl1_big.at[:TC, :].set(params["wl1"].reshape(TC, H1))
    wl1_big = wl1_big.at[R_ONE, :].set(params["bl1"])
    wl1_big = wl1_big.astype(bf16)

    # Linear2 padded to a 128-wide hidden; padded column H2 carries a constant 1
    # after ReLU (wl2_p[:,H2]=0, bl2_p[0,H2]=1) so Linear3's bias folds into wl3_p.
    wl2_p = jnp.zeros((H1, H2P), f32).at[:, :H2].set(params["wl2"]).astype(bf16)
    bl2_p = jnp.zeros((1, H2P), f32).at[0, :H2].set(params["bl2"]).at[0, H2].set(1.0)
    wl3_p = (jnp.zeros((H2P, OUT), f32)
             .at[:H2, :].set(params["wl3"])
             .at[H2, :].set(params["bl3"])
             .astype(bf16))

    return (w1band, wband, wl1_big, wl2_p, bl2_p, wl3_p)


def _full_spec(a):
    n = a.ndim
    return pl.BlockSpec(a.shape, lambda i, n=n: (0,) * n)


def mynet_forward(sup_inp, que_inp, params):
    """sup_inp: (bz_sup, T, 1), que_inp: (bz_que, T, 1). Returns (bz_sup*bz_que,)."""
    bz_sup, bz_que = sup_inp.shape[0], que_inp.shape[0]
    B = bz_sup + bz_que
    bpad = ((B + 7) // 8) * 8                         # 8-sublane granule

    # PyTorch permutes (B, T, 1) -> (B, 1, T); we just squeeze the channel, zero-pad
    # the time axis for k=3/pad=1, pad the batch to a sublane multiple, and append
    # the constant-1 column consumed by the conv1 band matmul.
    x = jnp.concatenate([sup_inp[..., 0], que_inp[..., 0]], axis=0).astype(jnp.float32)
    x = jnp.pad(x, ((0, bpad - B), (1, 1)))                                # (Bpad, T+2)
    x_aug = jnp.concatenate([x, jnp.ones((bpad, 1), jnp.float32)], axis=1)  # (Bpad, 8)

    args = (x_aug,) + _pack_operands(params)
    kernel = functools.partial(_mynet_kernel, bz_sup=bz_sup, bz_que=bz_que)

    # NOTE(batching): for multi-episode workloads add a leading grid axis over
    # episodes marked "parallel" (v7x: 2 TCs), tile only x/out, keep the constant
    # index_maps on the weights (VMEM-resident, optionally pl.Buffered(1)), and
    # size batch tiles against v7x's 64 MiB VMEM.  At B = 5 one step is optimal.
    out2d = pl.pallas_call(
        kernel,
        out_shape=jax.ShapeDtypeStruct((bz_sup, bz_que), jnp.float32),
        grid=(1,),
        in_specs=[_full_spec(a) for a in args],
        out_specs=pl.BlockSpec((bz_sup, bz_que), lambda i: (0, 0)),
        compiler_params=pltpu.CompilerParams(dimension_semantics=("arbitrary",)),
    )(*args)
    return out2d.reshape(-1)


def init_params(key):
    ks = jax.random.split(key, 10)

    def xavier(k, fan_in, fan_out, shape):                # nn.init.xavier_normal_
        std = (2.0 / (fan_in + fan_out)) ** 0.5
        return std * jax.random.normal(k, shape, jnp.float32)

    def conv_init(k, fan_in, shape):                      # kaiming-uniform-ish scale
        std = (1.0 / fan_in) ** 0.5
        return std * jax.random.normal(k, shape, jnp.float32)

    def bias_init(k, fan_in, shape):                      # PyTorch-style small bias
        bound = (1.0 / fan_in) ** 0.5
        return jax.random.uniform(k, shape, jnp.float32, -bound, bound)

    # Linear1 weight: PyTorch shape (512, C*T) with flatten index c*T + t.
    # Stored here as (T, C, 512) taps: wl1[t, c, o] == W_pt[o, c*T + t].
    wl1 = jnp.transpose(xavier(ks[3], T * C, H1, (C, T, H1)), (1, 0, 2))

    return {
        "w1": conv_init(ks[0], 1 * KSZ, (KSZ, C)),        # conv1 (tap, c_out), c_in = 1
        "b1": bias_init(ks[6], 1 * KSZ, (C,)),
        "w2": conv_init(ks[1], C * KSZ, (KSZ, C, C)),     # conv2 (tap, c_in, c_out)
        "b2": bias_init(ks[7], C * KSZ, (C,)),
        "ws": conv_init(ks[2], 1, (C,)),                  # 1x1 shortcut conv
        "bs": bias_init(ks[8], 1, (C,)),
        "wl1": wl1,
        "bl1": bias_init(ks[9], T * C, (H1,)),
        "wl2": xavier(ks[4], H1, H2, (H1, H2)),
        "bl2": jnp.zeros((H2,), jnp.float32),
        "wl3": xavier(ks[5], H2, OUT, (H2, OUT)),
        "bl3": jnp.zeros((OUT,), jnp.float32),
    }


if __name__ == "__main__":
    key = jax.random.PRNGKey(0)
    kp, ksup, kque = jax.random.split(key, 3)
    params = init_params(kp)

    bz_sup, bz_que = 2, 3
    sup = jax.random.normal(ksup, (bz_sup, T, 1), jnp.float32)
    que = jax.random.normal(kque, (bz_que, T, 1), jnp.float32)

    out = mynet_forward(sup, que, params)
    jax.block_until_ready(out)
    assert out.shape == (bz_sup * bz_que,)
    assert bool(jnp.all(jnp.isfinite(out)))
    print("KERNEL_OK")
</pallas_src>

<mosaic_0001>
module attributes {stable_mosaic.version = 11 : i64} {
  func.func @_mynet_kernel(%arg0: i32, %arg1: memref<8x8xf32, #tpu.memory_space<vmem>>, %arg2: memref<8x256xbf16, #tpu.memory_space<vmem>>, %arg3: memref<256x256xbf16, #tpu.memory_space<vmem>>, %arg4: memref<256x512xbf16, #tpu.memory_space<vmem>>, %arg5: memref<512x128xbf16, #tpu.memory_space<vmem>>, %arg6: memref<1x128xf32, #tpu.memory_space<vmem>>, %arg7: memref<128x4xbf16, #tpu.memory_space<vmem>>, %arg8: memref<2x3xf32, #tpu.memory_space<vmem>>) attributes {dimension_semantics = [#tpu.dimension_semantics<arbitrary>], iteration_bounds = array<i64: 1>, scalar_prefetch = 0 : i64, scratch_operands = 0 : i64, tpu.core_type = #tpu.core_type<tc>, window_params = [{pipeline_mode = #tpu.pipeline_mode<synchronous>, transform_indices = @transform_0, window_bounds = array<i64: 8, 8>}, {pipeline_mode = #tpu.pipeline_mode<synchronous>, transform_indices = @transform_1, window_bounds = array<i64: 8, 256>}, {pipeline_mode = #tpu.pipeline_mode<synchronous>, transform_indices = @transform_2, window_bounds = array<i64: 256, 256>}, {pipeline_mode = #tpu.pipeline_mode<synchronous>, transform_indices = @transform_3, window_bounds = array<i64: 256, 512>}, {pipeline_mode = #tpu.pipeline_mode<synchronous>, transform_indices = @transform_4, window_bounds = array<i64: 512, 128>}, {pipeline_mode = #tpu.pipeline_mode<synchronous>, transform_indices = @transform_5, window_bounds = array<i64: 1, 128>}, {pipeline_mode = #tpu.pipeline_mode<synchronous>, transform_indices = @transform_6, window_bounds = array<i64: 128, 4>}, {pipeline_mode = #tpu.pipeline_mode<synchronous>, transform_indices = @transform_7, window_bounds = array<i64: 2, 3>}]} {
    %c0 = arith.constant 0 : index
    %c0_0 = arith.constant 0 : index
    %0 = vector.load %arg1[%c0, %c0_0] : memref<8x8xf32, #tpu.memory_space<vmem>>, vector<8x8xf32>
    %1 = arith.truncf %0 : vector<8x8xf32> to vector<8x8xbf16>
    %c0_1 = arith.constant 0 : index
    %c0_2 = arith.constant 0 : index
    %2 = vector.load %arg2[%c0_1, %c0_2] : memref<8x256xbf16, #tpu.memory_space<vmem>>, vector<8x256xbf16>
    %cst = arith.constant dense<0.000000e+00> : vector<8x256xf32>
    %3 = tpu.matmul %1, %2, %cst {dimension_numbers = #tpu.dot_dimension_numbers<[1], [0], [0], [1], [0, 0, 1, 1], [], []>} : vector<8x8xbf16>, vector<8x256xbf16>, vector<8x256xf32> -> vector<8x256xf32>
    %4 = tpu.iota {dimensions = array<i32: 1>} : vector<1x256xi32>
    %c160_i32 = arith.constant 160 : i32
    %5 = vector.broadcast %c160_i32 : i32 to vector<1x256xi32>
    %6 = arith.cmpi slt, %4, %5 : vector<1x256xi32>
    %cst_3 = arith.constant 0.000000e+00 : f32
    %7 = vector.broadcast %cst_3 : f32 to vector<8x256xf32>
    %8 = arith.maximumf %3, %7 : vector<8x256xf32>
    %9 = vector.shape_cast %6 : vector<1x256xi1> to vector<1x256xi1>
    %10 = vector.broadcast %9 : vector<1x256xi1> to vector<8x256xi1>
    %11 = arith.select %10, %8, %3 : vector<8x256xi1>, vector<8x256xf32>
    %12 = arith.truncf %11 : vector<8x256xf32> to vector<8x256xbf16>
    %c0_4 = arith.constant 0 : index
    %c0_5 = arith.constant 0 : index
    %13 = vector.load %arg3[%c0_4, %c0_5] : memref<256x256xbf16, #tpu.memory_space<vmem>>, vector<256x256xbf16>
    %cst_6 = arith.constant dense<0.000000e+00> : vector<8x256xf32>
    %14 = tpu.matmul %12, %13, %cst_6 {dimension_numbers = #tpu.dot_dimension_numbers<[1], [0], [0], [1], [0, 0, 1, 1], [], []>} : vector<8x256xbf16>, vector<256x256xbf16>, vector<8x256xf32> -> vector<8x256xf32>
    %cst_7 = arith.constant 0.000000e+00 : f32
    %15 = vector.broadcast %cst_7 : f32 to vector<8x256xf32>
    %16 = arith.maximumf %14, %15 : vector<8x256xf32>
    %17 = arith.truncf %16 : vector<8x256xf32> to vector<8x256xbf16>
    %c0_8 = arith.constant 0 : index
    %c0_9 = arith.constant 0 : index
    %18 = vector.load %arg4[%c0_8, %c0_9] : memref<256x512xbf16, #tpu.memory_space<vmem>>, vector<256x512xbf16>
    %cst_10 = arith.constant dense<0.000000e+00> : vector<8x512xf32>
    %19 = tpu.matmul %17, %18, %cst_10 {dimension_numbers = #tpu.dot_dimension_numbers<[1], [0], [0], [1], [0, 0, 1, 1], [], []>} : vector<8x256xbf16>, vector<256x512xbf16>, vector<8x512xf32> -> vector<8x512xf32>
    %cst_11 = arith.constant 0.000000e+00 : f32
    %20 = vector.broadcast %cst_11 : f32 to vector<8x512xf32>
    %21 = arith.maximumf %19, %20 : vector<8x512xf32>
    %22 = arith.truncf %21 : vector<8x512xf32> to vector<8x512xbf16>
    %c0_12 = arith.constant 0 : index
    %c0_13 = arith.constant 0 : index
    %23 = vector.load %arg5[%c0_12, %c0_13] : memref<512x128xbf16, #tpu.memory_space<vmem>>, vector<512x128xbf16>
    %cst_14 = arith.constant dense<0.000000e+00> : vector<8x128xf32>
    %24 = tpu.matmul %22, %23, %cst_14 {dimension_numbers = #tpu.dot_dimension_numbers<[1], [0], [0], [1], [0, 0, 1, 1], [], []>} : vector<8x512xbf16>, vector<512x128xbf16>, vector<8x128xf32> -> vector<8x128xf32>
    %c0_15 = arith.constant 0 : index
    %c0_16 = arith.constant 0 : index
    %25 = vector.load %arg6[%c0_15, %c0_16] : memref<1x128xf32, #tpu.memory_space<vmem>>, vector<1x128xf32>
    %26 = vector.broadcast %25 : vector<1x128xf32> to vector<8x128xf32>
    %27 = arith.addf %24, %26 : vector<8x128xf32>
    %cst_17 = arith.constant 0.000000e+00 : f32
    %28 = vector.broadcast %cst_17 : f32 to vector<8x128xf32>
    %29 = arith.maximumf %27, %28 : vector<8x128xf32>
    %30 = arith.truncf %29 : vector<8x128xf32> to vector<8x128xbf16>
    %c0_18 = arith.constant 0 : index
    %c0_19 = arith.constant 0 : index
    %31 = vector.load %arg7[%c0_18, %c0_19] : memref<128x4xbf16, #tpu.memory_space<vmem>>, vector<128x4xbf16>
    %cst_20 = arith.constant dense<0.000000e+00> : vector<8x4xf32>
    %32 = tpu.matmul %30, %31, %cst_20 {dimension_numbers = #tpu.dot_dimension_numbers<[1], [0], [0], [1], [0, 0, 1, 1], [], []>} : vector<8x128xbf16>, vector<128x4xbf16>, vector<8x4xf32> -> vector<8x4xf32>
    %33 = vector.extract_strided_slice %32 {offsets = [0, 0], sizes = [2, 4], strides = [1, 1]} : vector<8x4xf32> to vector<2x4xf32>
    %34 = vector.extract_strided_slice %32 {offsets = [2, 0], sizes = [3, 4], strides = [1, 1]} : vector<8x4xf32> to vector<3x4xf32>
    %35 = vector.shape_cast %33 : vector<2x4xf32> to vector<2x1x4xf32>
    %36 = vector.shape_cast %34 : vector<3x4xf32> to vector<1x3x4xf32>
    %37 = vector.broadcast %35 : vector<2x1x4xf32> to vector<2x3x4xf32>
    %38 = vector.broadcast %36 : vector<1x3x4xf32> to vector<2x3x4xf32>
    %39 = arith.subf %37, %38 : vector<2x3x4xf32>
    %cst_21 = arith.constant 9.99999997E-7 : f32
    %40 = vector.broadcast %cst_21 : f32 to vector<2x3x4xf32>
    %41 = arith.addf %39, %40 : vector<2x3x4xf32>
    %42 = arith.mulf %41, %41 : vector<2x3x4xf32>
    %cst_22 = arith.constant dense<0.000000e+00> : vector<2x3xf32>
    %43 = vector.multi_reduction <add>, %42, %cst_22 [2] : vector<2x3x4xf32> to vector<2x3xf32>
    %44 = math.sqrt %43 : vector<2x3xf32>
    %c0_23 = arith.constant 0 : index
    %c0_24 = arith.constant 0 : index
    %45 = vector.load %arg8[%c0_23, %c0_24] : memref<2x3xf32, #tpu.memory_space<vmem>>, vector<2x3xf32>
    tpu.vector_store %arg8[%c0_23, %c0_24], %44 {strides = array<i32>} : memref<2x3xf32, #tpu.memory_space<vmem>>, vector<2x3xf32>,
    return
  }
  func.func @transform_0(%arg0: i32) -> (i32, i32) {
    %c0_i32 = arith.constant 0 : i32
    %c0_i32_0 = arith.constant 0 : i32
    %c0_i32_1 = arith.constant 0 : i32
    return %c0_i32, %c0_i32_0 : i32, i32
  }
  func.func @transform_1(%arg0: i32) -> (i32, i32) {
    %c0_i32 = arith.constant 0 : i32
    %c0_i32_0 = arith.constant 0 : i32
    %c0_i32_1 = arith.constant 0 : i32
    return %c0_i32, %c0_i32_0 : i32, i32
  }
  func.func @transform_2(%arg0: i32) -> (i32, i32) {
    %c0_i32 = arith.constant 0 : i32
    %c0_i32_0 = arith.constant 0 : i32
    %c0_i32_1 = arith.constant 0 : i32
    return %c0_i32, %c0_i32_0 : i32, i32
  }
  func.func @transform_3(%arg0: i32) -> (i32, i32) {
    %c0_i32 = arith.constant 0 : i32
    %c0_i32_0 = arith.constant 0 : i32
    %c0_i32_1 = arith.constant 0 : i32
    return %c0_i32, %c0_i32_0 : i32, i32
  }
  func.func @transform_4(%arg0: i32) -> (i32, i32) {
    %c0_i32 = arith.constant 0 : i32
    %c0_i32_0 = arith.constant 0 : i32
    %c0_i32_1 = arith.constant 0 : i32
    return %c0_i32, %c0_i32_0 : i32, i32
  }
  func.func @transform_5(%arg0: i32) -> (i32, i32) {
    %c0_i32 = arith.constant 0 : i32
    %c0_i32_0 = arith.constant 0 : i32
    %c0_i32_1 = arith.constant 0 : i32
    return %c0_i32, %c0_i32_0 : i32, i32
  }
  func.func @transform_6(%arg0: i32) -> (i32, i32) {
    %c0_i32 = arith.constant 0 : i32
    %c0_i32_0 = arith.constant 0 : i32
    %c0_i32_1 = arith.constant 0 : i32
    return %c0_i32, %c0_i32_0 : i32, i32
  }
  func.func @transform_7(%arg0: i32) -> (i32, i32) {
    %c0_i32 = arith.constant 0 : i32
    %c0_i32_0 = arith.constant 0 : i32
    %c0_i32_1 = arith.constant 0 : i32
    return %c0_i32, %c0_i32_0 : i32, i32
  }
}

</mosaic_0001>

<bundles_post_ra>
// kernel: tpu_custom_call.1
= control target key start
LH: loop header
LB: loop body
LE: loop exit
PB: predicated region body
PF: predicated region fallthrough
CT: control target
= control target key end

     0   :  { %12 = vsyncpa [#allocation3], 0  ;;  %s2005_s0 = inlined_call_operand.vmem [shape: f32[8,8], index: 0, kind: input, shape index: {}]   ;;  %s2006_s1 = inlined_call_operand.vmem [shape: bf16[8,256], index: 1, kind: input, shape index: {}]   ;;  %s2007_s2 = inlined_call_operand.hbm [shape: bf16[256,256], index: 2, kind: input, shape index: {}]   ;;  %s2008_s3 = inlined_call_operand.hbm [shape: bf16[256,512], index: 3, kind: input, shape index: {}]   ;;  %s2009_s4 = inlined_call_operand.hbm [shape: bf16[512,128], index: 4, kind: input, shape index: {}]   ;;  %s2010_s5 = inlined_call_operand.vmem [shape: f32[1,128], index: 5, kind: input, shape index: {}]   ;;  %s2011_s6 = inlined_call_operand.vmem [shape: bf16[128,4], index: 6, kind: input, shape index: {}]   ;;  %s2012_s7 = inlined_call_operand.hbm [shape: f32[2,3], index: 7, kind: output, shape index: {}]  }
   0x1   :  { %13 = vsyncpa [#allocation6], 0 }
   0x2   :  { %14 = vsyncpa [#allocation4], 0  ;;  %s1900_s24 = smov [#allocation5]  }
   0x3   :  { %s36_s25 = sshll.u32 %s1900_s24, 4  ;;  %s37_s25 = int_to_ptr.vmem [resolvable:$true] %s36_s25 }
   0x4   :  { %s1822_s26 = scalar_lea.vmem %s37_s25, 8192  ;;  %p1827_p1 = scmp.lt.s32.totalorder %s37_s25, %s37_s25 }
   0x5   :  { %p1823_p0 = scmp.ne.s32.totalorder %s37_s25, %s1822_s26  ;;  %p1828_p2 = scmp.lt.s32.totalorder %s1822_s26, %s1822_s26 }
   0x7   :  { %p1829_p3 = por %p1828_p2, %p1827_p1 }
   0x9   :  { %p1830_p4 = pnand %p1829_p3, %p1823_p0 }
   0xb   :  { %1833 = shalt.err (!%p1830_p4)
}
   0xc   :  { %s1901_s27 = smov 256   ;;  %s1902_s28 = smov 16  }
   0xd   :  { %42 = dma.hbm_to_vmem [thread:$0]  %s2008_s3, 8192, %s37_s25, [#allocation6], %s1901_s27, %s1901_s27, %s1902_s28  }
   0xe   :  { %s1903_s8 = smov [#allocation2]  }
   0xf   :  { %s24_s9 = sshll.u32 %s1903_s8, 4  ;;  %s25_s9 = int_to_ptr.vmem [resolvable:$true] %s24_s9 }
  0x10   :  { %s1842_s10 = scalar_lea.vmem %s25_s9, 4096  ;;  %p1847_p6 = scmp.lt.s32.totalorder %s25_s9, %s25_s9 }
  0x11   :  { %p1843_p5 = scmp.ne.s32.totalorder %s25_s9, %s1842_s10  ;;  %p1848_p7 = scmp.lt.s32.totalorder %s1842_s10, %s1842_s10 }
  0x13   :  { %p1849_p8 = por %p1848_p7, %p1847_p6 }
  0x15   :  { %p1850_p9 = pnand %p1849_p8, %p1843_p5 }
  0x17   :  { %1853 = shalt.err (!%p1850_p9)
}
  0x18   :  { %s1904_s11 = smov 128   ;;  %s1905_s12 = smov 8  }
  0x19   :  { %30 = dma.hbm_to_vmem [thread:$0]  %s2007_s2, 4096, %s25_s9, [#allocation3], %s1904_s11, %s1904_s11, %s1905_s12  }
  0x1a   :  { %s1906_s15 = smov [#allocation7]  }
  0x1b   :  { %s48_s16 = sshll.u32 %s1906_s15, 4  ;;  %s49_s16 = int_to_ptr.vmem [resolvable:$true] %s48_s16 }
  0x1c   :  { %s1862_s3 = scalar_lea.vmem %s49_s16, 4096  ;;  %p1867_p11 = scmp.lt.s32.totalorder %s49_s16, %s49_s16 }
  0x1d   :  { %p1863_p10 = scmp.ne.s32.totalorder %s49_s16, %s1862_s3  ;;  %p1868_p12 = scmp.lt.s32.totalorder %s1862_s3, %s1862_s3 }
  0x1f   :  { %p1869_p13 = por %p1868_p12, %p1867_p11 }
  0x21   :  { %p1870_p0 = pnand %p1869_p13, %p1863_p10 }
  0x23   :  { %1873 = shalt.err (!%p1870_p0)
}
  0x24   :  { %s1907_s17 = smov 64   ;;  %s1908_s18 = smov 4  }
  0x25   :  { %54 = dma.hbm_to_vmem [thread:$0]  %s2009_s4, 4096, %s49_s16, [#allocation6], %s1907_s17, %s1907_s17, %s1908_s18  }
  0x26   :  { %1894 = dma.done.wait [#allocation3], 4096  }
  0x27   :  { %1895 = vsyncadd [#allocation3], 4294963200 }
  0x28   :  { %1896 = dma.done.wait [#allocation6], 12288  }
  0x29   :  { %1897 = vsyncadd [#allocation6], 4294955008  ;;  %v1909_v0 = vmov 0   ;;  %v71_v1 = vld [vmem:[%s2006_s1] sm:$0xff]  ;;  %vm81_vm0 = vcmask 1043456   ;;  %vm77_vm1 = vcmask 64512  }
  0x2a   :  { %120 = vmatprep.mubr.bf16.mxu0 %v1909_v0  ;;  %v69_v2 = vld [vmem:[%s2005_s0] sm:$0xff]  ;;  %v1397_v3 = vcombine.high %v71_v1, %v71_v1  ;;  %v1396_v4 = vcombine.low %v71_v1, %v71_v1  ;;  %v1626_v5 = vld [vmem:[#allocation2 + $0x74] ss:$8 sps:$4 sm:$0xff]   ;;  %v1628_v6 = vld [vmem:[#allocation2 + $0x70] ss:$8 sps:$4 sm:$0xff]   ;;  %vm1911_vm3 = vmmov 0  }
  0x2b   :  { %v1629_v7 = vld [vmem:[#allocation2 + $0x64] ss:$8 sps:$4 sm:$0xff]   ;;  %v70_v9 = vpack.c.bf16 %v69_v2, %v69_v2  ;;  %336 = vmatprep.subr.bf16.mxu1 %v1626_v5  ;;  %v1631_v10 = vld [vmem:[#allocation2 + $0x60] ss:$8 sps:$4 sm:$0xff]   ;;  %v1632_v11 = vld [vmem:[#allocation2 + $0x54] ss:$8 sps:$4 sm:$0xff]  }
  0x2c   :  { %1398 = vmatprep.subr.msk.bf16.mxu0 %vm81_vm0, %v1397_v3  ;;  %v83_v8 = vsel %vm81_vm0, %v1396_v4, 0  ;;  %337 = vmatpush1.bf16.msra.mxu1 %v1628_v6  ;;  %v1634_v12 = vld [vmem:[#allocation2 + $0x50] ss:$8 sps:$4 sm:$0xff]   ;;  %v1635_v13 = vld [vmem:[#allocation2 + $0x44] ss:$8 sps:$4 sm:$0xff]   ;;  %v129_v4 = vlaneseq  ;;  %vm1343_vm4 = vcmask 28674  }
  0x2d   :  { %103 = vmatpush1.bf16.msra.mxu0 %v83_v8  ;;  %338 = vmatprep.subr.bf16.mxu1 %v1629_v7  ;;  %v1637_v14 = vld [vmem:[#allocation2 + $0x40] ss:$8 sps:$4 sm:$0xff]   ;;  %v1638_v15 = vld [vmem:[#allocation2 + $0x34] ss:$8 sps:$4 sm:$0xff]   ;;  %v1640_v16 = vld [vmem:[#allocation2 + $0x30] ss:$8 sps:$4 sm:$0xff]  }
  0x2e   :  { %v1641_v17 = vld [vmem:[#allocation2 + $0x24] ss:$8 sps:$4 sm:$0xff]   ;;  %v1643_v18 = vld [vmem:[#allocation2 + $0x20] ss:$8 sps:$4 sm:$0xff]   ;;  %v1644_v19 = vld [vmem:[#allocation2 + $0x14] ss:$8 sps:$4 sm:$0xff]  }
  0x2f   :  { %v1646_v20 = vld [vmem:[#allocation2 + $0x10] ss:$8 sps:$4 sm:$0xff]   ;;  %v1647_v21 = vld [vmem:[#allocation2 + $0x4] ss:$8 sps:$4 sm:$0xff]   ;;  %v1649_v22 = vld [vmem:[#allocation2] ss:$8 sps:$4 sm:$0xff]  }
  0x30   :  { %1399 = vmatmul.mubr.msk.bf16.vlgmr.msra.gmra.mxu0 %vm77_vm1, %v70_v9  ;;  %339 = vmatpush1.bf16.msra.mxu1 %v1631_v10  ;;  %v1650_v23 = vld [vmem:[#allocation2 + $0xf4] ss:$8 sps:$4 sm:$0xff]   ;;  %v1652_v24 = vld [vmem:[#allocation2 + $0xf0] ss:$8 sps:$4 sm:$0xff]   ;;  %v1653_v25 = vld [vmem:[#allocation2 + $0xe4] ss:$8 sps:$4 sm:$0xff]  }
  0x31   :  { %340 = vmatprep.subr.bf16.mxu1 %v1632_v11  ;;  %v1655_v26 = vld [vmem:[#allocation2 + $0xe0] ss:$8 sps:$4 sm:$0xff]   ;;  %v1656_v27 = vld [vmem:[#allocation2 + $0xd4] ss:$8 sps:$4 sm:$0xff]   ;;  %v1658_v28 = vld [vmem:[#allocation2 + $0xd0] ss:$8 sps:$4 sm:$0xff]  }
  0x32   :  { %v1659_v29 = vld [vmem:[#allocation2 + $0xc4] ss:$8 sps:$4 sm:$0xff]   ;;  %v1661_v30 = vld [vmem:[#allocation2 + $0xc0] ss:$8 sps:$4 sm:$0xff]   ;;  %v1662_v31 = vld [vmem:[#allocation2 + $0xb4] ss:$8 sps:$4 sm:$0xff]  }
  0x33   :  { %v1664_v32 = vld [vmem:[#allocation2 + $0xb0] ss:$8 sps:$4 sm:$0xff]   ;;  %v1665_v33 = vld [vmem:[#allocation2 + $0xa4] ss:$8 sps:$4 sm:$0xff]   ;;  %v1667_v34 = vld [vmem:[#allocation2 + $0xa0] ss:$8 sps:$4 sm:$0xff]  }
  0x34   :  { %341 = vmatpush1.bf16.msra.mxu1 %v1634_v12  ;;  %v1668_v35 = vld [vmem:[#allocation2 + $0x94] ss:$8 sps:$4 sm:$0xff]   ;;  %v1670_v36 = vld [vmem:[#allocation2 + $0x90] ss:$8 sps:$4 sm:$0xff]   ;;  %v1671_v37 = vld [vmem:[#allocation2 + $0x84] ss:$8 sps:$4 sm:$0xff]  }
  0x35   :  { %342 = vmatprep.subr.bf16.mxu1 %v1635_v13  ;;  %v1673_v38 = vld [vmem:[#allocation2 + $0x80] ss:$8 sps:$4 sm:$0xff]   ;;  %v1676_v40 = vld [vmem:[#allocation5 + $0xe4] ss:$16 sps:$4 sm:$0xff]   ;;  %v1679_v41 = vld [vmem:[#allocation5 + $0xec] ss:$16 sps:$4 sm:$0xff]  }
  0x36   :  { %v1674_v39 = vld [vmem:[#allocation5 + $0xe0] ss:$16 sps:$4 sm:$0xff]   ;;  %v1682_v42 = vld [vmem:[#allocation5 + $0xc4] ss:$16 sps:$4 sm:$0xff]   ;;  %765 = vmatprep.subr.bf16.mxu0 %v1676_v40  ;;  %v1970_v5 = vand.u32 127, %v129_v4  ;;  %vm1375_vm9 = vcmask 1043459  }
  0x37   :  { %766 = vmatpush1.bf16.msra.mxu0 %v1674_v39  ;;  %v1680_v43 = vld [vmem:[#allocation5 + $0xc0] ss:$16 sps:$4 sm:$0xff]   ;;  %v1688_v44 = vld [vmem:[#allocation5 + $0xa4] ss:$16 sps:$4 sm:$0xff]   ;;  %v1751_v39 = vld [vmem:[#allocation5 + $0x16c] ss:$16 sps:$4 sm:$0xff]  }
  0x38   :  { %343 = vmatpush1.bf16.msra.mxu1 %v1637_v14  ;;  %767 = vmatprep.subr.bf16.mxu0 %v1682_v42  ;;  %v1686_v45 = vld [vmem:[#allocation5 + $0xa0] ss:$16 sps:$4 sm:$0xff]   ;;  %v1694_v46 = vld [vmem:[#allocation5 + $0x84] ss:$16 sps:$4 sm:$0xff]   ;;  %v131_v6 = vadd.s32 128, %v1970_v5  ;;  %vm1378_vm10 = vcmask 19458  }
  0x39   :  { %344 = vmatprep.subr.bf16.mxu1 %v1638_v15  ;;  %v1692_v47 = vld [vmem:[#allocation5 + $0x80] ss:$16 sps:$4 sm:$0xff]   ;;  %v1700_v48 = vld [vmem:[#allocation5 + $0x64] ss:$16 sps:$4 sm:$0xff]   ;;  %v1677_v15 = vld [vmem:[#allocation5 + $0xe8] ss:$16 sps:$4 sm:$0xff]  }
  0x3a   :  { %v1698_v49 = vld [vmem:[#allocation5 + $0x60] ss:$16 sps:$4 sm:$0xff]   ;;  %v1706_v50 = vld [vmem:[#allocation5 + $0x44] ss:$16 sps:$4 sm:$0xff]   ;;  %vm133_vm2 = vcmp.lt.s32.totalorder %v131_v6, 160  ;;  %v1779_v6 = vld [vmem:[#allocation7 + $0x18] sm:$0xff]  }
  0x3b   :  { %768 = vmatpush1.bf16.msra.mxu0 %v1680_v43  ;;  %v1704_v51 = vld [vmem:[#allocation5 + $0x40] ss:$16 sps:$4 sm:$0xff]   ;;  %v1712_v52 = vld [vmem:[#allocation5 + $0x24] ss:$16 sps:$4 sm:$0xff]   ;;  %v1749_v40 = vld [vmem:[#allocation5 + $0x168] ss:$16 sps:$4 sm:$0xff]  }
  0x3c   :  { %345 = vmatpush1.bf16.msra.mxu1 %v1640_v16  ;;  %769 = vmatprep.subr.bf16.mxu0 %v1688_v44  ;;  %v1710_v53 = vld [vmem:[#allocation5 + $0x20] ss:$16 sps:$4 sm:$0xff]   ;;  %v1718_v54 = vld [vmem:[#allocation5 + $0x4] ss:$16 sps:$4 sm:$0xff]   ;;  %v1755_v42 = vld [vmem:[#allocation5 + $0x148] ss:$16 sps:$4 sm:$0xff]  }
  0x3d   :  { %346 = vmatprep.subr.bf16.mxu1 %v1641_v17  ;;  %v1716_v55 = vld [vmem:[#allocation5] ss:$16 sps:$4 sm:$0xff]   ;;  %v1724_v56 = vld [vmem:[#allocation5 + $0x1e4] ss:$16 sps:$4 sm:$0xff]   ;;  %v1685_v17 = vld [vmem:[#allocation5 + $0xcc] ss:$16 sps:$4 sm:$0xff]  }
  0x3e   :  { %v1722_v57 = vld [vmem:[#allocation5 + $0x1e0] ss:$16 sps:$4 sm:$0xff]   ;;  %v1730_v58 = vld [vmem:[#allocation5 + $0x1c4] ss:$16 sps:$4 sm:$0xff]   ;;  %v1763_v44 = vld [vmem:[#allocation5 + $0x12c] ss:$16 sps:$4 sm:$0xff]  }
  0x3f   :  { %770 = vmatpush1.bf16.msra.mxu0 %v1686_v45  ;;  %v1728_v59 = vld [vmem:[#allocation5 + $0x1c0] ss:$16 sps:$4 sm:$0xff]   ;;  %v1736_v60 = vld [vmem:[#allocation5 + $0x1a4] ss:$16 sps:$4 sm:$0xff]  }
  0x40   :  { %347 = vmatpush1.bf16.msra.mxu1 %v1643_v18  ;;  %771 = vmatprep.subr.bf16.mxu0 %v1694_v46  ;;  %v1734_v61 = vld [vmem:[#allocation5 + $0x1a0] ss:$16 sps:$4 sm:$0xff]   ;;  %v1742_v62 = vld [vmem:[#allocation5 + $0x184] ss:$16 sps:$4 sm:$0xff]   ;;  %v1683_v18 = vld [vmem:[#allocation5 + $0xc8] ss:$16 sps:$4 sm:$0xff]  }
  0x41   :  { %348 = vmatprep.subr.bf16.mxu1 %v1644_v19  ;;  %v1740_v63 = vld [vmem:[#allocation5 + $0x180] ss:$16 sps:$4 sm:$0xff]   ;;  %v1748_v0 = vld [vmem:[#allocation5 + $0x164] ss:$16 sps:$4 sm:$0xff]   ;;  %v1691_v19 = vld [vmem:[#allocation5 + $0xac] ss:$16 sps:$4 sm:$0xff]  }
  0x42   :  { %v1746_v1 = vld [vmem:[#allocation5 + $0x160] ss:$16 sps:$4 sm:$0xff]   ;;  %v1754_v2 = vld [vmem:[#allocation5 + $0x144] ss:$16 sps:$4 sm:$0xff]   ;;  %v1761_v46 = vld [vmem:[#allocation5 + $0x128] ss:$16 sps:$4 sm:$0xff]  }
  0x43   :  { %772 = vmatpush1.bf16.msra.mxu0 %v1692_v47  ;;  %v1752_v3 = vld [vmem:[#allocation5 + $0x140] ss:$16 sps:$4 sm:$0xff]   ;;  %v1760_v43 = vld [vmem:[#allocation5 + $0x124] ss:$16 sps:$4 sm:$0xff]  }
  0x44   :  { %349 = vmatpush1.bf16.msra.mxu1 %v1646_v20  ;;  %773 = vmatprep.subr.bf16.mxu0 %v1700_v48  ;;  %v1689_v20 = vld [vmem:[#allocation5 + $0xa8] ss:$16 sps:$4 sm:$0xff]   ;;  %v1758_v45 = vld [vmem:[#allocation5 + $0x120] ss:$16 sps:$4 sm:$0xff]   ;;  %v1766_v47 = vld [vmem:[#allocation5 + $0x104] ss:$16 sps:$4 sm:$0xff]  }
  0x45   :  { %350 = vmatprep.subr.bf16.mxu1 %v1647_v21  ;;  %v1697_v21 = vld [vmem:[#allocation5 + $0x8c] ss:$16 sps:$4 sm:$0xff]  }
  0x46   :  { %v1769_v48 = vld [vmem:[#allocation5 + $0x10c] ss:$16 sps:$4 sm:$0xff]  }
  0x47   :  { %774 = vmatpush1.bf16.msra.mxu0 %v1698_v49  ;;  %v1764_v49 = vld [vmem:[#allocation5 + $0x100] ss:$16 sps:$4 sm:$0xff]  }
  0x48   :  { %351 = vmatpush1.bf16.msra.mxu1 %v1649_v22  ;;  %775 = vmatprep.subr.bf16.mxu0 %v1706_v50  ;;  %v1695_v22 = vld [vmem:[#allocation5 + $0x88] ss:$16 sps:$4 sm:$0xff]  }
  0x49   :  { %352 = vmatprep.subr.bf16.mxu1 %v1650_v23  ;;  %v1703_v23 = vld [vmem:[#allocation5 + $0x6c] ss:$16 sps:$4 sm:$0xff]   ;;  %v1767_v50 = vld [vmem:[#allocation5 + $0x108] ss:$16 sps:$4 sm:$0xff]  }
  0x4b   :  { %776 = vmatpush1.bf16.msra.mxu0 %v1704_v51  ;;  %v1770_v51 = vld [vmem:[#allocation7 + $0x78] sm:$0xff]  }
  0x4c   :  { %353 = vmatpush2.bf16.msra.mxu1 %v1652_v24  ;;  %777 = vmatprep.subr.bf16.mxu0 %v1712_v52  ;;  %v1701_v24 = vld [vmem:[#allocation5 + $0x68] ss:$16 sps:$4 sm:$0xff]  }
  0x4d   :  { %354 = vmatprep.subr.bf16.mxu1 %v1653_v25  ;;  %v1709_v25 = vld [vmem:[#allocation5 + $0x4c] ss:$16 sps:$4 sm:$0xff]  }
  0x4f   :  { %778 = vmatpush1.bf16.msra.mxu0 %v1710_v53 }
  0x50   :  { %355 = vmatpush2.bf16.msra.mxu1 %v1655_v26  ;;  %779 = vmatprep.subr.bf16.mxu0 %v1718_v54  ;;  %v1707_v26 = vld [vmem:[#allocation5 + $0x48] ss:$16 sps:$4 sm:$0xff]  }
  0x51   :  { %356 = vmatprep.subr.bf16.mxu1 %v1656_v27  ;;  %v1715_v27 = vld [vmem:[#allocation5 + $0x2c] ss:$16 sps:$4 sm:$0xff]  }
  0x53   :  { %780 = vmatpush1.bf16.msra.mxu0 %v1716_v55 }
  0x54   :  { %357 = vmatpush2.bf16.msra.mxu1 %v1658_v28  ;;  %781 = vmatprep.subr.bf16.mxu0 %v1724_v56  ;;  %v1713_v28 = vld [vmem:[#allocation5 + $0x28] ss:$16 sps:$4 sm:$0xff]  }
  0x55   :  { %358 = vmatprep.subr.bf16.mxu1 %v1659_v29  ;;  %v1721_v29 = vld [vmem:[#allocation5 + $0xc] ss:$16 sps:$4 sm:$0xff]  }
  0x57   :  { %782 = vmatpush2.bf16.msra.mxu0 %v1722_v57 }
  0x58   :  { %359 = vmatpush2.bf16.msra.mxu1 %v1661_v30  ;;  %783 = vmatprep.subr.bf16.mxu0 %v1730_v58  ;;  %v1719_v30 = vld [vmem:[#allocation5 + $0x8] ss:$16 sps:$4 sm:$0xff]  }
  0x59   :  { %360 = vmatprep.subr.bf16.mxu1 %v1662_v31  ;;  %v1727_v31 = vld [vmem:[#allocation5 + $0x1ec] ss:$16 sps:$4 sm:$0xff]  }
  0x5a   :  { %v1771_v58 = vld [vmem:[#allocation7 + $0x38] sm:$0xff]  }
  0x5b   :  { %784 = vmatpush2.bf16.msra.mxu0 %v1728_v59 }
  0x5c   :  { %361 = vmatpush2.bf16.msra.mxu1 %v1664_v32  ;;  %785 = vmatprep.subr.bf16.mxu0 %v1736_v60  ;;  %v1725_v32 = vld [vmem:[#allocation5 + $0x1e8] ss:$16 sps:$4 sm:$0xff]  }
  0x5d   :  { %362 = vmatprep.subr.bf16.mxu1 %v1665_v33  ;;  %v1733_v33 = vld [vmem:[#allocation5 + $0x1cc] ss:$16 sps:$4 sm:$0xff]  }
  0x5f   :  { %786 = vmatpush2.bf16.msra.mxu0 %v1734_v61  ;;  %v1772_v61 = vld [vmem:[#allocation7 + $0x70] sm:$0xff]  }
  0x60   :  { %363 = vmatpush2.bf16.msra.mxu1 %v1667_v34  ;;  %787 = vmatprep.subr.bf16.mxu0 %v1742_v62  ;;  %v1731_v34 = vld [vmem:[#allocation5 + $0x1c8] ss:$16 sps:$4 sm:$0xff]   ;;  %v1773_v62 = vld [vmem:[#allocation7 + $0x30] sm:$0xff]  }
  0x61   :  { %364 = vmatprep.subr.bf16.mxu1 %v1668_v35  ;;  %v1739_v35 = vld [vmem:[#allocation5 + $0x1ac] ss:$16 sps:$4 sm:$0xff]  }
  0x63   :  { %788 = vmatpush2.bf16.msra.mxu0 %v1740_v63  ;;  %v1774_v63 = vld [vmem:[#allocation7 + $0x68] sm:$0xff]  }
  0x64   :  { %365 = vmatpush2.bf16.msra.mxu1 %v1670_v36  ;;  %789 = vmatprep.subr.bf16.mxu0 %v1748_v0  ;;  %v1737_v36 = vld [vmem:[#allocation5 + $0x1a8] ss:$16 sps:$4 sm:$0xff]  }
  0x65   :  { %366 = vmatprep.subr.bf16.mxu1 %v1671_v37  ;;  %v1745_v37 = vld [vmem:[#allocation5 + $0x18c] ss:$16 sps:$4 sm:$0xff]  }
  0x66   :  { %v1775_v0 = vld [vmem:[#allocation7 + $0x28] sm:$0xff]  }
  0x67   :  { %790 = vmatpush2.bf16.msra.mxu0 %v1746_v1  ;;  %v1776_v1 = vld [vmem:[#allocation7 + $0x60] sm:$0xff]  }
  0x68   :  { %367 = vmatpush2.bf16.msra.mxu1 %v1673_v38  ;;  %791 = vmatprep.subr.bf16.mxu0 %v1754_v2  ;;  %v1743_v38 = vld [vmem:[#allocation5 + $0x188] ss:$16 sps:$4 sm:$0xff]   ;;  %v1777_v2 = vld [vmem:[#allocation7 + $0x20] sm:$0xff]  }
  0x69   :  { %806 = vmatprep.subr.bf16.mxu1 %v1679_v41  ;;  %v1757_v41 = vld [vmem:[#allocation5 + $0x14c] ss:$16 sps:$4 sm:$0xff]  }
  0x6b   :  { %792 = vmatpush2.bf16.msra.mxu0 %v1752_v3  ;;  %v1778_v3 = vld [vmem:[#allocation7 + $0x58] sm:$0xff]  }
  0x6c   :  { %793 = vmatprep.subr.bf16.mxu0 %v1760_v43 }
  0x6f   :  { %794 = vmatpush2.bf16.msra.mxu0 %v1758_v45  ;;  %v1802_v45 = vld [vmem:[%s2011_s6 + $0x38] sm:$0xff]  }
  0x70   :  { %795 = vmatprep.subr.bf16.mxu0 %v1766_v47  ;;  %v1803_v47 = vld [vmem:[%s2011_s6 + $0x30] sm:$0xff]  }
  0x73   :  { %796 = vmatpush2.bf16.msra.mxu0 %v1764_v49  ;;  %v1805_v49 = vld [vmem:[%s2011_s6 + $0x20] sm:$0xff]  }
  0x74   :  { %1537 = vmatprep.subr.bf16.mxu0 %v1770_v51  ;;  %v1807_v51 = vld [vmem:[%s2011_s6 + $0x10] sm:$0xff]  }
  0xf0   :  { %v122_v7 = vpop.f32.mrf.mxu0 }
  0xf1   :  { %v134_v9 = vmax.f32 %v122_v7, 0.0  ;;  %v1780_v7 = vld [vmem:[#allocation7 + $0x50] sm:$0xff]  }
  0xf2   :  { %v124_v8 = vpop.f32.mrf.mxu0 }
  0xf3   :  { %v135_v10 = vmax.f32 %v124_v8, 0.0  ;;  %v142_v16 = vpack.c.bf16 %v134_v9, %v134_v9  ;;  %v1782_v9 = vld [vmem:[#allocation7 + $0x48] sm:$0xff]  }
  0xf4   :  { %v126_v11 = vpop.f32.mrf.mxu0 }
  0xf5   :  { %v141_v12 = vsel %vm133_vm2, %v135_v10, %v124_v8  ;;  %v1781_v8 = vld [vmem:[#allocation7 + $0x10] sm:$0xff]   ;;  %v1783_v10 = vld [vmem:[#allocation7 + $0x8] sm:$0xff]   ;;  %v1784_v11 = vld [vmem:[#allocation7 + $0x40] sm:$0xff]  }
  0xf6   :  { %v127_v13 = vpop.f32.mrf.mxu0  ;;  %v143_v14 = vpack.c.bf16 %v141_v12, %v141_v12  ;;  %v1785_v12 = vld [vmem:[#allocation7] sm:$0xff]  }
  0xf7   :  { %v1786_v13 = vld [vmem:[#allocation7 + $0xf8] sm:$0xff]  }
  0xf8   :  { %368 = vmatprep.mubr.bf16.mxu1 %v143_v14 }
  0xf9   :  { %369 = vmatmul.mubr.bf16.vlgmr.msra.gmra.mxu1 %v142_v16 }
  0xfa   :  { %807 = vmatpush1.bf16.msra.mxu1 %v1677_v15 }
  0xfb   :  { %808 = vmatprep.subr.bf16.mxu1 %v1685_v17 }
  0xfe   :  { %809 = vmatpush1.bf16.msra.mxu1 %v1683_v18 }
  0xff   :  { %810 = vmatprep.subr.bf16.mxu1 %v1691_v19 }
 0x102   :  { %811 = vmatpush1.bf16.msra.mxu1 %v1689_v20 }
 0x103   :  { %812 = vmatprep.subr.bf16.mxu1 %v1697_v21 }
 0x106   :  { %813 = vmatpush1.bf16.msra.mxu1 %v1695_v22 }
 0x107   :  { %814 = vmatprep.subr.bf16.mxu1 %v1703_v23 }
 0x10a   :  { %815 = vmatpush1.bf16.msra.mxu1 %v1701_v24  ;;  %v1787_v24 = vld [vmem:[#allocation7 + $0xb8] sm:$0xff]  }
 0x10b   :  { %816 = vmatprep.subr.bf16.mxu1 %v1709_v25 }
 0x10e   :  { %817 = vmatpush1.bf16.msra.mxu1 %v1707_v26 }
 0x10f   :  { %818 = vmatprep.subr.bf16.mxu1 %v1715_v27 }
 0x112   :  { %819 = vmatpush1.bf16.msra.mxu1 %v1713_v28  ;;  %v1788_v28 = vld [vmem:[#allocation7 + $0xf0] sm:$0xff]  }
 0x113   :  { %820 = vmatprep.subr.bf16.mxu1 %v1721_v29 }
 0x116   :  { %821 = vmatpush1.bf16.msra.mxu1 %v1719_v30  ;;  %v1789_v30 = vld [vmem:[#allocation7 + $0xb0] sm:$0xff]  }
 0x117   :  { %822 = vmatprep.subr.bf16.mxu1 %v1727_v31  ;;  %v1790_v31 = vld [vmem:[#allocation7 + $0xe8] sm:$0xff]  }
 0x11a   :  { %823 = vmatpush2.bf16.msra.mxu1 %v1725_v32  ;;  %v1791_v32 = vld [vmem:[#allocation7 + $0xa8] sm:$0xff]  }
 0x11b   :  { %824 = vmatprep.subr.bf16.mxu1 %v1733_v33  ;;  %v1792_v33 = vld [vmem:[#allocation7 + $0xe0] sm:$0xff]  }
 0x11e   :  { %825 = vmatpush2.bf16.msra.mxu1 %v1731_v34  ;;  %v1793_v34 = vld [vmem:[#allocation7 + $0xa0] sm:$0xff]  }
 0x11f   :  { %826 = vmatprep.subr.bf16.mxu1 %v1739_v35  ;;  %v1794_v35 = vld [vmem:[#allocation7 + $0xd8] sm:$0xff]  }
 0x122   :  { %827 = vmatpush2.bf16.msra.mxu1 %v1737_v36  ;;  %v1795_v36 = vld [vmem:[#allocation7 + $0x98] sm:$0xff]  }
 0x123   :  { %828 = vmatprep.subr.bf16.mxu1 %v1745_v37  ;;  %v1796_v37 = vld [vmem:[#allocation7 + $0xd0] sm:$0xff]  }
 0x126   :  { %829 = vmatpush2.bf16.msra.mxu1 %v1743_v38  ;;  %v1797_v38 = vld [vmem:[#allocation7 + $0x90] sm:$0xff]  }
 0x127   :  { %830 = vmatprep.subr.bf16.mxu1 %v1751_v39  ;;  %v1798_v39 = vld [vmem:[#allocation7 + $0xc8] sm:$0xff]  }
 0x12a   :  { %831 = vmatpush2.bf16.msra.mxu1 %v1749_v40  ;;  %v1799_v40 = vld [vmem:[#allocation7 + $0x88] sm:$0xff]  }
 0x12b   :  { %832 = vmatprep.subr.bf16.mxu1 %v1757_v41  ;;  %v1800_v41 = vld [vmem:[#allocation7 + $0xc0] sm:$0xff]  }
 0x12e   :  { %833 = vmatpush2.bf16.msra.mxu1 %v1755_v42  ;;  %v1801_v42 = vld [vmem:[#allocation7 + $0x80] sm:$0xff]  }
 0x12f   :  { %834 = vmatprep.subr.bf16.mxu1 %v1763_v44 }
 0x132   :  { %835 = vmatpush2.bf16.msra.mxu1 %v1761_v46  ;;  %v1910_v46 = vmov 0.0  }
 0x133   :  { %836 = vmatprep.subr.bf16.mxu1 %v1769_v48  ;;  %v1804_v48 = vld [vmem:[%s2011_s6 + $0x28] sm:$0xff]  }
 0x136   :  { %837 = vmatpush2.bf16.msra.mxu1 %v1767_v50  ;;  %v1806_v50 = vld [vmem:[%s2011_s6 + $0x18] sm:$0xff]  }
 0x137   :  { %1590 = vmatprep.subr.bf16.mxu1 %v1910_v46 }
 0x1b9   :  { %v370_v52 = vpop.f32.mrf.mxu1 }
 0x1ba   :  { %v377_v53 = vmax.f32 %v370_v52, 0.0  ;;  %v1808_v52 = vld [vmem:[%s2011_s6 + $0x8] sm:$0xff]  }
 0x1bb   :  { %v372_v54 = vpop.f32.mrf.mxu1 }
 0x1bc   :  { %v378_v55 = vmax.f32 %v372_v54, 0.0  ;;  %v379_v59 = vpack.c.bf16 %v377_v53, %v377_v53  ;;  %v1809_v53 = vld [vmem:[%s2011_s6] sm:$0xff]  }
 0x1bd   :  { %v374_v56 = vpop.f32.mrf.mxu1 }
 0x1be   :  { %v380_v57 = vpack.c.bf16 %v378_v55, %v378_v55 }
 0x1bf   :  { %v375_v60 = vpop.f32.mrf.mxu1 }
 0x1c0   :  { %797 = vmatprep.mubr.bf16.mxu0 %v380_v57  ;;  %838 = vmatprep.mubr.bf16.mxu1 %v380_v57 }
 0x1c1   :  { %798 = vmatmul.mubr.bf16.vlgmr.msra.gmra.mxu0 %v379_v59  ;;  %839 = vmatmul.mubr.bf16.vlgmr.msra.gmra.mxu1 %v379_v59  ;;  %v1496_v59 = vld [vmem:[%s2010_s5] ss:$0 sm:$0xff]  ;;  %s1913_s5 = smov [#allocation8]  }
 0x1c2   :  { %1538 = vmatpush3.bf16.msra.mxu0 %v1771_v58  ;;  %1591 = vmatpush3.bf16.msra.mxu1 %v1802_v45  ;;  %s1386_s6 = sshll.u32 %s1913_s5, 4  ;;  %s1387_s6 = int_to_ptr.vmem [resolvable:$true] %s1386_s6 }
 0x1c3   :  { %1539 = vmatprep.subr.bf16.mxu0 %v1772_v61  ;;  %1592 = vmatprep.subr.bf16.mxu1 %v1910_v46  ;;  %s1874_s16 = scalar_lea.vmem %s1387_s6, 32  ;;  %p1879_p2 = scmp.lt.s32.totalorder %s1387_s6, %s1387_s6 }
 0x1c4   :  { %1606 = vmatprep.mubr.msk.bf16.mxu1 %vm1911_vm3, %v1910_v46  ;;  %p1875_p1 = scmp.ne.s32.totalorder %s1387_s6, %s1874_s16  ;;  %p1880_p3 = scmp.lt.s32.totalorder %s1874_s16, %s1874_s16 }
 0x1c6   :  { %1540 = vmatpush3.bf16.msra.mxu0 %v1773_v62  ;;  %1593 = vmatpush3.bf16.msra.mxu1 %v1803_v47  ;;  %p1881_p4 = por %p1880_p3, %p1879_p2 }
 0x1c7   :  { %1541 = vmatprep.subr.bf16.mxu0 %v1774_v63  ;;  %1594 = vmatprep.subr.bf16.mxu1 %v1910_v46 }
 0x1c8   :  { %p1882_p5 = pnand %p1881_p4, %p1875_p1 }
 0x1ca   :  { %1542 = vmatpush3.bf16.msra.mxu0 %v1775_v0  ;;  %1595 = vmatpush3.bf16.msra.mxu1 %v1804_v48 }
 0x1cb   :  { %1543 = vmatprep.subr.bf16.mxu0 %v1776_v1  ;;  %1596 = vmatprep.subr.bf16.mxu1 %v1910_v46 }
 0x1ce   :  { %1544 = vmatpush3.bf16.msra.mxu0 %v1777_v2  ;;  %1597 = vmatpush3.bf16.msra.mxu1 %v1805_v49 }
 0x1cf   :  { %1545 = vmatprep.subr.bf16.mxu0 %v1778_v3  ;;  %1598 = vmatprep.subr.bf16.mxu1 %v1910_v46 }
 0x1d2   :  { %1546 = vmatpush3.bf16.msra.mxu0 %v1779_v6  ;;  %1599 = vmatpush3.bf16.msra.mxu1 %v1806_v50 }
 0x1d3   :  { %1547 = vmatprep.subr.bf16.mxu0 %v1780_v7  ;;  %1600 = vmatprep.subr.bf16.mxu1 %v1910_v46  ;;  %v1912_v7 = vmov 1966171168  }
 0x1d6   :  { %1548 = vmatpush3.bf16.msra.mxu0 %v1781_v8  ;;  %1601 = vmatpush3.bf16.msra.mxu1 %v1807_v51  ;;  %v1306_v8 = vunpack.c.l.s4 %v1912_v7 }
 0x1d7   :  { %1549 = vmatprep.subr.bf16.mxu0 %v1782_v9  ;;  %1602 = vmatprep.subr.bf16.mxu1 %v1910_v46  ;;  %v1309_v9 = vshrl.u32 %v129_v4, 7 }
 0x1da   :  { %1550 = vmatpush3.bf16.msra.mxu0 %v1783_v10  ;;  %1603 = vmatpush3.bf16.msra.mxu1 %v1808_v52  ;;  %v1307_v10 = vunpack.c.0.s8 %v1306_v8 }
 0x1db   :  { %1551 = vmatprep.subr.bf16.mxu0 %v1784_v11  ;;  %1604 = vmatprep.subr.bf16.mxu1 %v1910_v46 }
 0x1dc   :  { %v1310_v11 = vsub.s32 %v1307_v10, %v1309_v9 }
 0x1de   :  { %1552 = vmatpush3.bf16.msra.mxu0 %v1785_v12  ;;  %1605 = vmatpush3.bf16.msra.mxu1 %v1809_v53 }
 0x1df   :  { %1559 = vmatprep.subr.bf16.mxu0 %v1786_v13 }
 0x281   :  { %v799_v14 = vpop.f32.mrf.mxu0  ;;  %v840_v15 = vpop.f32.mrf.mxu1 }
 0x282   :  { %v847_v16 = vmax.f32 %v799_v14, 0.0  ;;  %v849_v43 = vmax.f32 %v840_v15, 0.0  ;;  %v1329_v14 = vsub.s32 0, %v1309_v9 }
 0x283   :  { %v801_v17 = vpop.f32.mrf.mxu0  ;;  %v842_v18 = vpop.f32.mrf.mxu1 }
 0x284   :  { %v848_v19 = vmax.f32 %v801_v17, 0.0  ;;  %v850_v20 = vmax.f32 %v842_v18, 0.0  ;;  %v851_v25 = vpack.c.bf16 %v847_v16, %v847_v16  ;;  %v853_v44 = vpack.c.bf16 %v849_v43, %v849_v43 }
 0x285   :  { %v803_v21 = vpop.f32.mrf.mxu0  ;;  %v844_v22 = vpop.f32.mrf.mxu1 }
 0x286   :  { %v852_v23 = vpack.c.bf16 %v848_v19, %v848_v19  ;;  %v854_v29 = vpack.c.bf16 %v850_v20, %v850_v20 }
 0x287   :  { %v804_v26 = vpop.f32.mrf.mxu0  ;;  %v845_v27 = vpop.f32.mrf.mxu1 }
 0x288   :  { %1150 = vmatprep.mubr.bf16.mxu0 %v852_v23 }
 0x289   :  { %1151 = vmatmul.mubr.bf16.vlgmr.msra.gmra.mxu0 %v851_v25 }
 0x28a   :  { %1560 = vmatpush3.bf16.msra.mxu0 %v1787_v24  ;;  %1190 = vmatprep.mubr.bf16.mxu0 %v854_v29 }
 0x28b   :  { %1561 = vmatprep.subr.bf16.mxu0 %v1788_v28 }
 0x28e   :  { %1562 = vmatpush3.bf16.msra.mxu0 %v1789_v30 }
 0x28f   :  { %1563 = vmatprep.subr.bf16.mxu0 %v1790_v31 }
 0x292   :  { %1564 = vmatpush3.bf16.msra.mxu0 %v1791_v32 }
 0x293   :  { %1565 = vmatprep.subr.bf16.mxu0 %v1792_v33  ;;  %v1366_v33 = vadd.s32 2, %v1970_v5 }
 0x296   :  { %1566 = vmatpush3.bf16.msra.mxu0 %v1793_v34 }
 0x297   :  { %1567 = vmatprep.subr.bf16.mxu0 %v1794_v35 }
 0x29a   :  { %1568 = vmatpush3.bf16.msra.mxu0 %v1795_v36 }
 0x29b   :  { %1569 = vmatprep.subr.bf16.mxu0 %v1796_v37 }
 0x29e   :  { %1570 = vmatpush3.bf16.msra.mxu0 %v1797_v38  ;;  %v1369_v38 = vsub.s32 %v1366_v33, %v1309_v9 }
 0x29f   :  { %1571 = vmatprep.subr.bf16.mxu0 %v1798_v39 }
 0x2a2   :  { %1572 = vmatpush3.bf16.msra.mxu0 %v1799_v40 }
 0x2a3   :  { %1573 = vmatprep.subr.bf16.mxu0 %v1800_v41 }
 0x2a6   :  { %1574 = vmatpush3.bf16.msra.mxu0 %v1801_v42 }
 0x2a9   :  { %1191 = vmatmul.mubr.bf16.vlgmr.msra.gmra.mxu0 %v853_v44 }
 0x349   :  { %v1553_v54 = vpop.f32.mrf.mxu0 }
 0x34b   :  { %v1554_v55 = vpop.f32.mrf.mxu0 }
 0x34c   :  { %v1555_v58 = vadd.f32 %v1554_v55, %v1553_v54 }
 0x34d   :  { %v1556_v56 = vpop.f32.mrf.mxu0 }
 0x34e   :  { %v1153_v62 = vadd.f32 %v1555_v58, %v1496_v59 }
 0x34f   :  { %v1557_v57 = vpop.f32.mrf.mxu0 }
 0x369   :  { %v1575_v60 = vpop.f32.mrf.mxu0 }
 0x36b   :  { %v1576_v61 = vpop.f32.mrf.mxu0 }
 0x36c   :  { %v1577_v63 = vadd.f32 %v1576_v61, %v1575_v60 }
 0x36d   :  { %v1578_v0 = vpop.f32.mrf.mxu0 }
 0x36e   :  { %v1193_v1 = vadd.f32 %v1577_v63, %v1153_v62 }
 0x36f   :  { %v1579_v2 = vpop.f32.mrf.mxu0 }
 0x370   :  { %v1198_v3 = vmax.f32 %v1193_v1, 0.0 }
 0x372   :  { %v1199_v6 = vpack.c.bf16 %v1198_v3, %v1198_v3 }
 0x374   :  { %1607 = vmatmul.mubr.bf16.vlgmr.msra.gmra.mxu1 %v1199_v6 }
 0x434   :  { %v1298_v12 = vpop.f32.mrf.mxu1 }
 0x435   :  { %v1311_v13 = vrot.slane %v1298_v12, %v1310_v11 }
 0x436   :  { %v1608_v15 = vpop.f32.mrf.mxu1 }
 0x437   :  { %v1312_v16 = vcombine.high %v1311_v13, %v1311_v13  ;;  %v1319_v17 = vrot.slane %v1311_v13, %v1310_v11 }
 0x438   :  { %v1301_v18 = vpop.f32.mrf.mxu1 }
 0x439   :  { %v1330_v19 = vrot.slane %v1319_v17, %v1329_v14  ;;  %v1326_v20 = vrot.slane %v1312_v16, %v1310_v11 }
 0x43a   :  { %v1609_v21 = vpop.f32.mrf.mxu1 }
 0x43b   :  { %v1337_v22 = vsub.f32 %v1330_v19, %v1298_v12  ;;  %v1334_v23 = vrot.slane %v1326_v20, %v1329_v14 }
 0x43d   :  { %v1339_v24 = vadd.f32 1e-06, %v1337_v22  ;;  %v1338_v25 = vsub.f32 %v1334_v23, %v1298_v12 }
 0x43f   :  { %v1341_v26 = vmul.f32 %v1339_v24, %v1339_v24  ;;  %v1340_v27 = vadd.f32 1e-06, %v1338_v25 }
 0x441   :  { %v1344_v4 = vsel %vm1343_vm4, %v1341_v26, 0.0  ;;  %v1342_v28 = vmul.f32 %v1340_v27, %v1340_v27 }
 0x442   :  { %1345 = vadd.xlane.f32.xlu0 %v1344_v4 }
 0x443   :  { %v1347_v29 = vsel %vm1343_vm4, %v1342_v28, 0.0 }
 0x446   :  { %1348 = vadd.xlane.f32.xlu0 %v1347_v29 }
 0x4cb   :  { %v1346_v30 = vpop.xlane.xlu0 %1345 }
 0x4cc   :  { %1810 = vrsqrt.f32 %v1346_v30  ;;  %vm1352_vm5 = vcmp.eq.f32.partialorder %v1346_v30, inf  ;;  %v1355_v37 = vand.u32 2147483648, %v1346_v30  ;;  %vm1354_vm6 = vcmp.eq.f32.partialorder %v1346_v30, 0.0 }
 0x4cf   :  { %v1349_v31 = vpop.xlane.xlu0 %1348 }
 0x4d0   :  { %1812 = vrsqrt.f32 %v1349_v31  ;;  %vm1359_vm7 = vcmp.eq.f32.partialorder %v1349_v31, inf  ;;  %v1362_v40 = vand.u32 2147483648, %v1349_v31  ;;  %vm1361_vm8 = vcmp.eq.f32.partialorder %v1349_v31, 0.0 }
 0x4d9   :  { %v1811_v32 = vpop.eup %1810 }
 0x4da   :  { %v1351_v34 = vmul.f32 %v1811_v32, %v1346_v30 }
 0x4dc   :  { %v1353_v35 = vsel %vm1352_vm5, %v1346_v30, %v1351_v34 }
 0x4dd   :  { %v1813_v36 = vpop.eup %1812  ;;  %v1356_v41 = vsel %vm1354_vm6, %v1355_v37, %v1353_v35 }
 0x4de   :  { %v1358_v39 = vmul.f32 %v1813_v36, %v1349_v31  ;;  %v1370_v44 = vrot.slane %v1356_v41, %v1369_v38 }
 0x4e0   :  { %v1360_v42 = vsel %vm1359_vm7, %v1349_v31, %v1358_v39 }
 0x4e1   :  { %v1363_v43 = vsel %vm1361_vm8, %v1362_v40, %v1360_v42 }
 0x4e2   :  { %v1374_v45 = vrot.slane %v1363_v43, %v1369_v38 }
 0x4e4   :  { %v1376_v5 = vsel %vm1375_vm9, %v1374_v45, %v1370_v44 }
 0x4e5   :  { %1379 = vst.msk [vmem:[#allocation8 - $0x2] sm:$0xc] %vm1378_vm10, %v1376_v5 }
 0x4e6   :  { %1885 = shalt.err (!%p1882_p5)
}
 0x4e7   :  { %1389 = dma.vmem_to_hbm [thread:$0]  %s1387_s6, 32, %s2012_s7, [#allocation4]  }
 0x4e8   :  { %1898 = dma.done.wait [#allocation4], 32  }
 0x4e9   :  { %1899 = vsyncadd [#allocation4], 4294967264 }
 0x4ea   :  { %1393 = vsyncpa [#allocation3], 1 }
 0x4eb   :  { %1394 = vsyncpa [#allocation6], 1 }
 0x4ec   :  { %1395 = vsyncpa [#allocation4], 1 }

</bundles_post_ra>
